<compile_context>
chip_gen: v7x
topology: tpu7x:2x2x1
jax: 0.10.0
libtpu: 0.0.40
codegen_flags: <defaults>
</compile_context>

<pallas_src>
import functools

import jax
import jax.numpy as jnp
from jax.experimental import pallas as pl
from jax.experimental.pallas import tpu as pltpu


def critic_kernel(sobs_ref, wblk_ref, bcat_ref, wihp_ref, whh_ref, blstm_ref,
                  w3s_ref, w3h_ref, b3_ref, val_ref, hn_ref, cn_ref):
    N = sobs_ref.shape[0]                 # N = T*B, time-major rows t*B + b
    B, H = hn_ref.shape
    T = N // B
    H3 = 3 * H

    # ---- fused fc1+fc2: single MXU pass over the block-diagonal weight -------
    act = jax.nn.leaky_relu(
        jnp.dot(sobs_ref[...], wblk_ref[...], preferred_element_type=jnp.float32)
        + bcat_ref[...])                  # (N, 2H): cols [:H]=s_x, [H:]=obs_x

    # ---- fc3 state-half contribution (per row, lane reduce) ------------------
    vs = jnp.sum(act[:, :H] * w3s_ref[...], axis=-1, keepdims=True)      # (N, 1)

    # ---- ALL LSTM input-gate preactivations in one matmul --------------------
    # wih is zero-padded over the s_x columns, so the fused activation feeds it
    # directly; rows of xg stay time-major.
    xg = (jnp.dot(act, wihp_ref[...], preferred_element_type=jnp.float32)
          + blstm_ref[...])               # (N, 4H), gate order [i, f, o, g]

    # ---- LSTM recurrence, fully unrolled (T static) --------------------------
    whh = whh_ref[...]                    # loop-invariant, hoisted
    w3h = w3h_ref[...]
    h = jnp.zeros((B, H), jnp.float32)
    c = jnp.zeros((B, H), jnp.float32)
    vh_parts = []
    for t in range(T):                    # static, contiguous sublane slices
        gates = (xg[t * B:(t + 1) * B, :]
                 + jnp.dot(h, whh, preferred_element_type=jnp.float32))
        sig = jax.nn.sigmoid(gates[:, :H3])          # [i | f | o] one EUP push
        g = jnp.tanh(gates[:, H3:])                  # g, second EUP push
        c = sig[:, H:2 * H] * c + sig[:, :H] * g     # f*c + i*g
        h = sig[:, 2 * H:H3] * jnp.tanh(c)           # o*tanh(c)
        # fc3 LSTM half folded into the loop: per-step (B,1) contribution.
        vh_parts.append(jnp.sum(h * w3h, axis=-1, keepdims=True))

    hn_ref[...] = h
    cn_ref[...] = c
    # (N,1) time-major value column; lane-dense output only matters at scale.
    val_ref[...] = vs + jnp.concatenate(vh_parts, axis=0) + b3_ref[...]


def init_params(key, state_dim, obs_dim, hidden=64, out_dim=1):
    """PyTorch-convention parameters (gate order i,f,g,o; separate LSTM biases)."""
    ks = jax.random.split(key, 7)

    def xavier_uniform(k, fan_in, fan_out, gain):
        limit = gain * (6.0 / (fan_in + fan_out)) ** 0.5
        return jax.random.uniform(k, (fan_in, fan_out), jnp.float32, -limit, limit)

    gain_lrelu = (2.0 / (1.0 + 0.01 ** 2)) ** 0.5   # calculate_gain('leaky_relu')
    H = hidden
    u = 1.0 / (H ** 0.5)                            # PyTorch LSTM default init range
    return dict(
        w1=xavier_uniform(ks[0], state_dim, H, gain_lrelu),
        b1=jnp.zeros((1, H), jnp.float32),
        w2=xavier_uniform(ks[1], obs_dim, H, gain_lrelu),
        b2=jnp.zeros((1, H), jnp.float32),
        wih=jax.random.uniform(ks[2], (H, 4 * H), jnp.float32, -u, u),   # [i,f,g,o]
        whh=jax.random.uniform(ks[3], (H, 4 * H), jnp.float32, -u, u),
        bih=jax.random.uniform(ks[4], (1, 4 * H), jnp.float32, -u, u),
        bhh=jax.random.uniform(ks[5], (1, 4 * H), jnp.float32, -u, u),
        w3=xavier_uniform(ks[6], 2 * H, out_dim, 1.0).reshape(out_dim, 2 * H),
        b3=jnp.zeros((1, out_dim), jnp.float32),
    )


def prepare_params(p):
    """One-time conversion of PyTorch-layout params to the kernel layout:
      * fc1/fc2 fused into a block-diagonal (Ds+Do, 2H) weight + concat bias,
      * LSTM gate columns reordered [i,f,g,o] -> [i,f,o,g], biases folded,
      * wih zero-padded to (2H,4H) so it consumes the fused activation directly,
      * fc3 split into state / LSTM halves (kernel supports output_dim == 1)."""
    H = p["w1"].shape[1]
    assert p["w3"].shape[0] == 1, "kernel implements output_dim == 1 (module default)"
    Ds, Do = p["w1"].shape[0], p["w2"].shape[0]

    def reorder(w):   # last-axis columns: i,f,g,o  ->  i,f,o,g
        return jnp.concatenate(
            [w[..., :2 * H], w[..., 3 * H:4 * H], w[..., 2 * H:3 * H]], axis=-1)

    wblk = jnp.zeros((Ds + Do, 2 * H), jnp.float32)
    wblk = wblk.at[:Ds, :H].set(p["w1"]).at[Ds:, H:].set(p["w2"])
    wih_pad = jnp.concatenate(
        [jnp.zeros((H, 4 * H), jnp.float32), reorder(p["wih"])], axis=0)   # (2H, 4H)

    return dict(
        wblk=wblk,
        bcat=jnp.concatenate([p["b1"], p["b2"]], axis=-1),
        wih_pad=wih_pad,
        whh=reorder(p["whh"]),
        blstm=reorder(p["bih"] + p["bhh"]),
        w3s=p["w3"][:, :H], w3h=p["w3"][:, H:], b3=p["b3"],
    )


@jax.jit
def critic_forward(s, obs, kp):
    """s: (B, T, state_dim), obs: (B, T, obs_dim) — batch-first like PyTorch.
    `kp` must come from prepare_params()."""
    B, T, Ds = s.shape
    Do = obs.shape[2]
    H = kp["whh"].shape[0]

    # Feature-concat + time-major flatten (rows t*B + b) done wrapper-side under
    # jit: a tiny layout-plumbing copy that keeps the kernel free of gathers.
    sobs = jnp.concatenate([s.astype(jnp.float32), obs.astype(jnp.float32)], axis=-1)
    sobs_tm = jnp.transpose(sobs, (1, 0, 2)).reshape(T * B, Ds + Do)

    vspec = pl.BlockSpec(memory_space=pltpu.MemorySpace.VMEM)
    fn = pl.pallas_call(
        critic_kernel,
        out_shape=(
            jax.ShapeDtypeStruct((T * B, 1), jnp.float32),   # value, rows t*B+b
            jax.ShapeDtypeStruct((B, H), jnp.float32),       # h_n
            jax.ShapeDtypeStruct((B, H), jnp.float32),       # c_n
        ),
        in_specs=[vspec] * 9,
        out_specs=(vspec, vspec, vspec),
        # NOTE: at production sizes, add a leading "parallel" grid axis over
        # batch chunks and set pltpu.CompilerParams(vmem_limit_bytes=...) —
        # everything fits trivially in VMEM at these toy shapes.
    )
    val_tm, h_n, c_n = fn(
        sobs_tm, kp["wblk"], kp["bcat"], kp["wih_pad"],
        kp["whh"], kp["blstm"], kp["w3s"], kp["w3h"], kp["b3"],
    )
    state_value = jnp.transpose(val_tm.reshape(T, B, 1), (1, 0, 2))   # (B, T, 1)
    return state_value, (h_n[None], c_n[None])   # (num_layers=1, B, H) each


def _reference_forward(s, obs, p):
    """Pure-JAX reference with PyTorch semantics (self-check only)."""
    H = p["w1"].shape[1]
    dot = functools.partial(jnp.dot, precision=jax.lax.Precision.HIGHEST)
    s_x = jax.nn.leaky_relu(dot(s, p["w1"]) + p["b1"])
    obs_x = jax.nn.leaky_relu(dot(obs, p["w2"]) + p["b2"])
    B, T, _ = obs.shape
    h = jnp.zeros((B, H), jnp.float32)
    c = jnp.zeros((B, H), jnp.float32)
    outs = []
    for t in range(T):
        gates = (dot(obs_x[:, t, :], p["wih"]) + p["bih"]
                 + dot(h, p["whh"]) + p["bhh"])
        i = jax.nn.sigmoid(gates[:, :H])
        f = jax.nn.sigmoid(gates[:, H:2 * H])
        g = jnp.tanh(gates[:, 2 * H:3 * H])
        o = jax.nn.sigmoid(gates[:, 3 * H:])
        c = f * c + i * g
        h = o * jnp.tanh(c)
        outs.append(h)
    lstm_out = jnp.stack(outs, axis=1)
    cat = jnp.concatenate([s_x, lstm_out], axis=-1)
    val = dot(cat, p["w3"].T) + p["b3"]
    return val, h, c


if __name__ == "__main__":
    B, T = 2, 8
    STATE_DIM, OBS_DIM, HIDDEN = 10, 12, 64

    key = jax.random.PRNGKey(0)
    k_s, k_o, k_p = jax.random.split(key, 3)
    s = jax.random.normal(k_s, (B, T, STATE_DIM), jnp.float32)
    obs = jax.random.normal(k_o, (B, T, OBS_DIM), jnp.float32)

    params = init_params(k_p, STATE_DIM, OBS_DIM, hidden=HIDDEN, out_dim=1)
    kparams = prepare_params(params)

    state_value, (h_n, c_n) = critic_forward(s, obs, kparams)
    jax.block_until_ready((state_value, h_n, c_n))

    assert state_value.shape == (B, T, 1)
    assert h_n.shape == (1, B, HIDDEN) and c_n.shape == (1, B, HIDDEN)

    # Loose numerical self-check against a pure-JAX reference (PyTorch semantics);
    # tolerance absorbs MXU vs. HIGHEST-precision matmul differences.
    ref_val, ref_h, ref_c = _reference_forward(s, obs, params)
    assert jnp.allclose(state_value, ref_val, atol=5e-2, rtol=5e-2)
    assert jnp.allclose(h_n[0], ref_h, atol=5e-2, rtol=5e-2)
    assert jnp.allclose(c_n[0], ref_c, atol=5e-2, rtol=5e-2)

    # TODO(synk): optional non-zero initial hidden state `h` (forward arg) is not
    # plumbed through; it is always zeros like the PyTorch default (h=None).
    print("KERNEL_OK")
</pallas_src>

<mosaic_0001>
module attributes {stable_mosaic.version = 11 : i64} {
  func.func @critic_kernel(%arg0: memref<16x22xf32, #tpu.memory_space<vmem>>, %arg1: memref<22x128xf32, #tpu.memory_space<vmem>>, %arg2: memref<1x128xf32, #tpu.memory_space<vmem>>, %arg3: memref<128x256xf32, #tpu.memory_space<vmem>>, %arg4: memref<64x256xf32, #tpu.memory_space<vmem>>, %arg5: memref<1x256xf32, #tpu.memory_space<vmem>>, %arg6: memref<1x64xf32, #tpu.memory_space<vmem>>, %arg7: memref<1x64xf32, #tpu.memory_space<vmem>>, %arg8: memref<1x1xf32, #tpu.memory_space<vmem>>, %arg9: memref<16x1xf32, #tpu.memory_space<vmem>>, %arg10: memref<2x64xf32, #tpu.memory_space<vmem>>, %arg11: memref<2x64xf32, #tpu.memory_space<vmem>>) attributes {dimension_semantics = [], scalar_prefetch = 0 : i64, scratch_operands = 0 : i64, tpu.core_type = #tpu.core_type<tc>} {
    %c0 = arith.constant 0 : index
    %c0_0 = arith.constant 0 : index
    %0 = vector.load %arg0[%c0, %c0_0] : memref<16x22xf32, #tpu.memory_space<vmem>>, vector<16x22xf32>
    %c0_1 = arith.constant 0 : index
    %c0_2 = arith.constant 0 : index
    %1 = vector.load %arg1[%c0_1, %c0_2] : memref<22x128xf32, #tpu.memory_space<vmem>>, vector<22x128xf32>
    %cst = arith.constant dense<0.000000e+00> : vector<16x128xf32>
    %2 = tpu.matmul %0, %1, %cst {dimension_numbers = #tpu.dot_dimension_numbers<[1], [0], [0], [1], [0, 0, 1, 1], [], []>} : vector<16x22xf32>, vector<22x128xf32>, vector<16x128xf32> -> vector<16x128xf32>
    %c0_3 = arith.constant 0 : index
    %c0_4 = arith.constant 0 : index
    %3 = vector.load %arg2[%c0_3, %c0_4] : memref<1x128xf32, #tpu.memory_space<vmem>>, vector<1x128xf32>
    %4 = vector.broadcast %3 : vector<1x128xf32> to vector<16x128xf32>
    %5 = arith.addf %2, %4 : vector<16x128xf32>
    %cst_5 = arith.constant 0.000000e+00 : f32
    %6 = vector.broadcast %cst_5 : f32 to vector<16x128xf32>
    %7 = arith.cmpf oge, %5, %6 : vector<16x128xf32>
    %cst_6 = arith.constant 0.00999999977 : f32
    %8 = vector.broadcast %cst_6 : f32 to vector<16x128xf32>
    %9 = arith.mulf %8, %5 : vector<16x128xf32>
    %10 = arith.select %7, %5, %9 : vector<16x128xi1>, vector<16x128xf32>
    %11 = vector.extract_strided_slice %10 {offsets = [0, 0], sizes = [16, 64], strides = [1, 1]} : vector<16x128xf32> to vector<16x64xf32>
    %c0_7 = arith.constant 0 : index
    %c0_8 = arith.constant 0 : index
    %12 = vector.load %arg6[%c0_7, %c0_8] : memref<1x64xf32, #tpu.memory_space<vmem>>, vector<1x64xf32>
    %13 = vector.broadcast %12 : vector<1x64xf32> to vector<16x64xf32>
    %14 = arith.mulf %11, %13 : vector<16x64xf32>
    %cst_9 = arith.constant dense<0.000000e+00> : vector<16xf32>
    %15 = vector.multi_reduction <add>, %14, %cst_9 [1] : vector<16x64xf32> to vector<16xf32>
    %16 = vector.shape_cast %15 : vector<16xf32> to vector<16x1xf32>
    %c0_10 = arith.constant 0 : index
    %c0_11 = arith.constant 0 : index
    %17 = vector.load %arg3[%c0_10, %c0_11] : memref<128x256xf32, #tpu.memory_space<vmem>>, vector<128x256xf32>
    %cst_12 = arith.constant dense<0.000000e+00> : vector<16x256xf32>
    %18 = tpu.matmul %10, %17, %cst_12 {dimension_numbers = #tpu.dot_dimension_numbers<[1], [0], [0], [1], [0, 0, 1, 1], [], []>} : vector<16x128xf32>, vector<128x256xf32>, vector<16x256xf32> -> vector<16x256xf32>
    %c0_13 = arith.constant 0 : index
    %c0_14 = arith.constant 0 : index
    %19 = vector.load %arg5[%c0_13, %c0_14] : memref<1x256xf32, #tpu.memory_space<vmem>>, vector<1x256xf32>
    %20 = vector.broadcast %19 : vector<1x256xf32> to vector<16x256xf32>
    %21 = arith.addf %18, %20 : vector<16x256xf32>
    %c0_15 = arith.constant 0 : index
    %c0_16 = arith.constant 0 : index
    %22 = vector.load %arg4[%c0_15, %c0_16] : memref<64x256xf32, #tpu.memory_space<vmem>>, vector<64x256xf32>
    %c0_17 = arith.constant 0 : index
    %c0_18 = arith.constant 0 : index
    %23 = vector.load %arg7[%c0_17, %c0_18] : memref<1x64xf32, #tpu.memory_space<vmem>>, vector<1x64xf32>
    %cst_19 = arith.constant 0.000000e+00 : f32
    %24 = vector.broadcast %cst_19 : f32 to vector<2x64xf32>
    %cst_20 = arith.constant 0.000000e+00 : f32
    %25 = vector.broadcast %cst_20 : f32 to vector<2x64xf32>
    %26 = vector.extract_strided_slice %21 {offsets = [0, 0], sizes = [2, 256], strides = [1, 1]} : vector<16x256xf32> to vector<2x256xf32>
    %cst_21 = arith.constant dense<0.000000e+00> : vector<2x256xf32>
    %27 = tpu.matmul %24, %22, %cst_21 {dimension_numbers = #tpu.dot_dimension_numbers<[1], [0], [0], [1], [0, 0, 1, 1], [], []>} : vector<2x64xf32>, vector<64x256xf32>, vector<2x256xf32> -> vector<2x256xf32>
    %28 = arith.addf %26, %27 : vector<2x256xf32>
    %29 = vector.extract_strided_slice %28 {offsets = [0, 0], sizes = [2, 192], strides = [1, 1]} : vector<2x256xf32> to vector<2x192xf32>
    %30 = arith.negf %29 : vector<2x192xf32>
    %31 = math.exp %30 : vector<2x192xf32>
    %cst_22 = arith.constant 1.000000e+00 : f32
    %32 = vector.broadcast %cst_22 : f32 to vector<2x192xf32>
    %33 = arith.addf %32, %31 : vector<2x192xf32>
    %34 = arith.divf %32, %33 : vector<2x192xf32>
    %35 = vector.extract_strided_slice %28 {offsets = [0, 192], sizes = [2, 64], strides = [1, 1]} : vector<2x256xf32> to vector<2x64xf32>
    %36 = math.tanh %35 : vector<2x64xf32>
    %37 = vector.extract_strided_slice %34 {offsets = [0, 64], sizes = [2, 64], strides = [1, 1]} : vector<2x192xf32> to vector<2x64xf32>
    %38 = arith.mulf %37, %25 : vector<2x64xf32>
    %39 = vector.extract_strided_slice %34 {offsets = [0, 0], sizes = [2, 64], strides = [1, 1]} : vector<2x192xf32> to vector<2x64xf32>
    %40 = arith.mulf %39, %36 : vector<2x64xf32>
    %41 = arith.addf %38, %40 : vector<2x64xf32>
    %42 = vector.extract_strided_slice %34 {offsets = [0, 128], sizes = [2, 64], strides = [1, 1]} : vector<2x192xf32> to vector<2x64xf32>
    %43 = math.tanh %41 : vector<2x64xf32>
    %44 = arith.mulf %42, %43 : vector<2x64xf32>
    %45 = vector.broadcast %23 : vector<1x64xf32> to vector<2x64xf32>
    %46 = arith.mulf %44, %45 : vector<2x64xf32>
    %cst_23 = arith.constant dense<0.000000e+00> : vector<2xf32>
    %47 = vector.multi_reduction <add>, %46, %cst_23 [1] : vector<2x64xf32> to vector<2xf32>
    %48 = vector.shape_cast %47 : vector<2xf32> to vector<2x1xf32>
    %49 = vector.extract_strided_slice %21 {offsets = [2, 0], sizes = [2, 256], strides = [1, 1]} : vector<16x256xf32> to vector<2x256xf32>
    %cst_24 = arith.constant dense<0.000000e+00> : vector<2x256xf32>
    %50 = tpu.matmul %44, %22, %cst_24 {dimension_numbers = #tpu.dot_dimension_numbers<[1], [0], [0], [1], [0, 0, 1, 1], [], []>} : vector<2x64xf32>, vector<64x256xf32>, vector<2x256xf32> -> vector<2x256xf32>
    %51 = arith.addf %49, %50 : vector<2x256xf32>
    %52 = vector.extract_strided_slice %51 {offsets = [0, 0], sizes = [2, 192], strides = [1, 1]} : vector<2x256xf32> to vector<2x192xf32>
    %53 = arith.negf %52 : vector<2x192xf32>
    %54 = math.exp %53 : vector<2x192xf32>
    %cst_25 = arith.constant 1.000000e+00 : f32
    %55 = vector.broadcast %cst_25 : f32 to vector<2x192xf32>
    %56 = arith.addf %55, %54 : vector<2x192xf32>
    %57 = arith.divf %55, %56 : vector<2x192xf32>
    %58 = vector.extract_strided_slice %51 {offsets = [0, 192], sizes = [2, 64], strides = [1, 1]} : vector<2x256xf32> to vector<2x64xf32>
    %59 = math.tanh %58 : vector<2x64xf32>
    %60 = vector.extract_strided_slice %57 {offsets = [0, 64], sizes = [2, 64], strides = [1, 1]} : vector<2x192xf32> to vector<2x64xf32>
    %61 = arith.mulf %60, %41 : vector<2x64xf32>
    %62 = vector.extract_strided_slice %57 {offsets = [0, 0], sizes = [2, 64], strides = [1, 1]} : vector<2x192xf32> to vector<2x64xf32>
    %63 = arith.mulf %62, %59 : vector<2x64xf32>
    %64 = arith.addf %61, %63 : vector<2x64xf32>
    %65 = vector.extract_strided_slice %57 {offsets = [0, 128], sizes = [2, 64], strides = [1, 1]} : vector<2x192xf32> to vector<2x64xf32>
    %66 = math.tanh %64 : vector<2x64xf32>
    %67 = arith.mulf %65, %66 : vector<2x64xf32>
    %68 = vector.broadcast %23 : vector<1x64xf32> to vector<2x64xf32>
    %69 = arith.mulf %67, %68 : vector<2x64xf32>
    %cst_26 = arith.constant dense<0.000000e+00> : vector<2xf32>
    %70 = vector.multi_reduction <add>, %69, %cst_26 [1] : vector<2x64xf32> to vector<2xf32>
    %71 = vector.shape_cast %70 : vector<2xf32> to vector<2x1xf32>
    %72 = vector.extract_strided_slice %21 {offsets = [4, 0], sizes = [2, 256], strides = [1, 1]} : vector<16x256xf32> to vector<2x256xf32>
    %cst_27 = arith.constant dense<0.000000e+00> : vector<2x256xf32>
    %73 = tpu.matmul %67, %22, %cst_27 {dimension_numbers = #tpu.dot_dimension_numbers<[1], [0], [0], [1], [0, 0, 1, 1], [], []>} : vector<2x64xf32>, vector<64x256xf32>, vector<2x256xf32> -> vector<2x256xf32>
    %74 = arith.addf %72, %73 : vector<2x256xf32>
    %75 = vector.extract_strided_slice %74 {offsets = [0, 0], sizes = [2, 192], strides = [1, 1]} : vector<2x256xf32> to vector<2x192xf32>
    %76 = arith.negf %75 : vector<2x192xf32>
    %77 = math.exp %76 : vector<2x192xf32>
    %cst_28 = arith.constant 1.000000e+00 : f32
    %78 = vector.broadcast %cst_28 : f32 to vector<2x192xf32>
    %79 = arith.addf %78, %77 : vector<2x192xf32>
    %80 = arith.divf %78, %79 : vector<2x192xf32>
    %81 = vector.extract_strided_slice %74 {offsets = [0, 192], sizes = [2, 64], strides = [1, 1]} : vector<2x256xf32> to vector<2x64xf32>
    %82 = math.tanh %81 : vector<2x64xf32>
    %83 = vector.extract_strided_slice %80 {offsets = [0, 64], sizes = [2, 64], strides = [1, 1]} : vector<2x192xf32> to vector<2x64xf32>
    %84 = arith.mulf %83, %64 : vector<2x64xf32>
    %85 = vector.extract_strided_slice %80 {offsets = [0, 0], sizes = [2, 64], strides = [1, 1]} : vector<2x192xf32> to vector<2x64xf32>
    %86 = arith.mulf %85, %82 : vector<2x64xf32>
    %87 = arith.addf %84, %86 : vector<2x64xf32>
    %88 = vector.extract_strided_slice %80 {offsets = [0, 128], sizes = [2, 64], strides = [1, 1]} : vector<2x192xf32> to vector<2x64xf32>
    %89 = math.tanh %87 : vector<2x64xf32>
    %90 = arith.mulf %88, %89 : vector<2x64xf32>
    %91 = vector.broadcast %23 : vector<1x64xf32> to vector<2x64xf32>
    %92 = arith.mulf %90, %91 : vector<2x64xf32>
    %cst_29 = arith.constant dense<0.000000e+00> : vector<2xf32>
    %93 = vector.multi_reduction <add>, %92, %cst_29 [1] : vector<2x64xf32> to vector<2xf32>
    %94 = vector.shape_cast %93 : vector<2xf32> to vector<2x1xf32>
    %95 = vector.extract_strided_slice %21 {offsets = [6, 0], sizes = [2, 256], strides = [1, 1]} : vector<16x256xf32> to vector<2x256xf32>
    %cst_30 = arith.constant dense<0.000000e+00> : vector<2x256xf32>
    %96 = tpu.matmul %90, %22, %cst_30 {dimension_numbers = #tpu.dot_dimension_numbers<[1], [0], [0], [1], [0, 0, 1, 1], [], []>} : vector<2x64xf32>, vector<64x256xf32>, vector<2x256xf32> -> vector<2x256xf32>
    %97 = arith.addf %95, %96 : vector<2x256xf32>
    %98 = vector.extract_strided_slice %97 {offsets = [0, 0], sizes = [2, 192], strides = [1, 1]} : vector<2x256xf32> to vector<2x192xf32>
    %99 = arith.negf %98 : vector<2x192xf32>
    %100 = math.exp %99 : vector<2x192xf32>
    %cst_31 = arith.constant 1.000000e+00 : f32
    %101 = vector.broadcast %cst_31 : f32 to vector<2x192xf32>
    %102 = arith.addf %101, %100 : vector<2x192xf32>
    %103 = arith.divf %101, %102 : vector<2x192xf32>
    %104 = vector.extract_strided_slice %97 {offsets = [0, 192], sizes = [2, 64], strides = [1, 1]} : vector<2x256xf32> to vector<2x64xf32>
    %105 = math.tanh %104 : vector<2x64xf32>
    %106 = vector.extract_strided_slice %103 {offsets = [0, 64], sizes = [2, 64], strides = [1, 1]} : vector<2x192xf32> to vector<2x64xf32>
    %107 = arith.mulf %106, %87 : vector<2x64xf32>
    %108 = vector.extract_strided_slice %103 {offsets = [0, 0], sizes = [2, 64], strides = [1, 1]} : vector<2x192xf32> to vector<2x64xf32>
    %109 = arith.mulf %108, %105 : vector<2x64xf32>
    %110 = arith.addf %107, %109 : vector<2x64xf32>
    %111 = vector.extract_strided_slice %103 {offsets = [0, 128], sizes = [2, 64], strides = [1, 1]} : vector<2x192xf32> to vector<2x64xf32>
    %112 = math.tanh %110 : vector<2x64xf32>
    %113 = arith.mulf %111, %112 : vector<2x64xf32>
    %114 = vector.broadcast %23 : vector<1x64xf32> to vector<2x64xf32>
    %115 = arith.mulf %113, %114 : vector<2x64xf32>
    %cst_32 = arith.constant dense<0.000000e+00> : vector<2xf32>
    %116 = vector.multi_reduction <add>, %115, %cst_32 [1] : vector<2x64xf32> to vector<2xf32>
    %117 = vector.shape_cast %116 : vector<2xf32> to vector<2x1xf32>
    %118 = vector.extract_strided_slice %21 {offsets = [8, 0], sizes = [2, 256], strides = [1, 1]} : vector<16x256xf32> to vector<2x256xf32>
    %cst_33 = arith.constant dense<0.000000e+00> : vector<2x256xf32>
    %119 = tpu.matmul %113, %22, %cst_33 {dimension_numbers = #tpu.dot_dimension_numbers<[1], [0], [0], [1], [0, 0, 1, 1], [], []>} : vector<2x64xf32>, vector<64x256xf32>, vector<2x256xf32> -> vector<2x256xf32>
    %120 = arith.addf %118, %119 : vector<2x256xf32>
    %121 = vector.extract_strided_slice %120 {offsets = [0, 0], sizes = [2, 192], strides = [1, 1]} : vector<2x256xf32> to vector<2x192xf32>
    %122 = arith.negf %121 : vector<2x192xf32>
    %123 = math.exp %122 : vector<2x192xf32>
    %cst_34 = arith.constant 1.000000e+00 : f32
    %124 = vector.broadcast %cst_34 : f32 to vector<2x192xf32>
    %125 = arith.addf %124, %123 : vector<2x192xf32>
    %126 = arith.divf %124, %125 : vector<2x192xf32>
    %127 = vector.extract_strided_slice %120 {offsets = [0, 192], sizes = [2, 64], strides = [1, 1]} : vector<2x256xf32> to vector<2x64xf32>
    %128 = math.tanh %127 : vector<2x64xf32>
    %129 = vector.extract_strided_slice %126 {offsets = [0, 64], sizes = [2, 64], strides = [1, 1]} : vector<2x192xf32> to vector<2x64xf32>
    %130 = arith.mulf %129, %110 : vector<2x64xf32>
    %131 = vector.extract_strided_slice %126 {offsets = [0, 0], sizes = [2, 64], strides = [1, 1]} : vector<2x192xf32> to vector<2x64xf32>
    %132 = arith.mulf %131, %128 : vector<2x64xf32>
    %133 = arith.addf %130, %132 : vector<2x64xf32>
    %134 = vector.extract_strided_slice %126 {offsets = [0, 128], sizes = [2, 64], strides = [1, 1]} : vector<2x192xf32> to vector<2x64xf32>
    %135 = math.tanh %133 : vector<2x64xf32>
    %136 = arith.mulf %134, %135 : vector<2x64xf32>
    %137 = vector.broadcast %23 : vector<1x64xf32> to vector<2x64xf32>
    %138 = arith.mulf %136, %137 : vector<2x64xf32>
    %cst_35 = arith.constant dense<0.000000e+00> : vector<2xf32>
    %139 = vector.multi_reduction <add>, %138, %cst_35 [1] : vector<2x64xf32> to vector<2xf32>
    %140 = vector.shape_cast %139 : vector<2xf32> to vector<2x1xf32>
    %141 = vector.extract_strided_slice %21 {offsets = [10, 0], sizes = [2, 256], strides = [1, 1]} : vector<16x256xf32> to vector<2x256xf32>
    %cst_36 = arith.constant dense<0.000000e+00> : vector<2x256xf32>
    %142 = tpu.matmul %136, %22, %cst_36 {dimension_numbers = #tpu.dot_dimension_numbers<[1], [0], [0], [1], [0, 0, 1, 1], [], []>} : vector<2x64xf32>, vector<64x256xf32>, vector<2x256xf32> -> vector<2x256xf32>
    %143 = arith.addf %141, %142 : vector<2x256xf32>
    %144 = vector.extract_strided_slice %143 {offsets = [0, 0], sizes = [2, 192], strides = [1, 1]} : vector<2x256xf32> to vector<2x192xf32>
    %145 = arith.negf %144 : vector<2x192xf32>
    %146 = math.exp %145 : vector<2x192xf32>
    %cst_37 = arith.constant 1.000000e+00 : f32
    %147 = vector.broadcast %cst_37 : f32 to vector<2x192xf32>
    %148 = arith.addf %147, %146 : vector<2x192xf32>
    %149 = arith.divf %147, %148 : vector<2x192xf32>
    %150 = vector.extract_strided_slice %143 {offsets = [0, 192], sizes = [2, 64], strides = [1, 1]} : vector<2x256xf32> to vector<2x64xf32>
    %151 = math.tanh %150 : vector<2x64xf32>
    %152 = vector.extract_strided_slice %149 {offsets = [0, 64], sizes = [2, 64], strides = [1, 1]} : vector<2x192xf32> to vector<2x64xf32>
    %153 = arith.mulf %152, %133 : vector<2x64xf32>
    %154 = vector.extract_strided_slice %149 {offsets = [0, 0], sizes = [2, 64], strides = [1, 1]} : vector<2x192xf32> to vector<2x64xf32>
    %155 = arith.mulf %154, %151 : vector<2x64xf32>
    %156 = arith.addf %153, %155 : vector<2x64xf32>
    %157 = vector.extract_strided_slice %149 {offsets = [0, 128], sizes = [2, 64], strides = [1, 1]} : vector<2x192xf32> to vector<2x64xf32>
    %158 = math.tanh %156 : vector<2x64xf32>
    %159 = arith.mulf %157, %158 : vector<2x64xf32>
    %160 = vector.broadcast %23 : vector<1x64xf32> to vector<2x64xf32>
    %161 = arith.mulf %159, %160 : vector<2x64xf32>
    %cst_38 = arith.constant dense<0.000000e+00> : vector<2xf32>
    %162 = vector.multi_reduction <add>, %161, %cst_38 [1] : vector<2x64xf32> to vector<2xf32>
    %163 = vector.shape_cast %162 : vector<2xf32> to vector<2x1xf32>
    %164 = vector.extract_strided_slice %21 {offsets = [12, 0], sizes = [2, 256], strides = [1, 1]} : vector<16x256xf32> to vector<2x256xf32>
    %cst_39 = arith.constant dense<0.000000e+00> : vector<2x256xf32>
    %165 = tpu.matmul %159, %22, %cst_39 {dimension_numbers = #tpu.dot_dimension_numbers<[1], [0], [0], [1], [0, 0, 1, 1], [], []>} : vector<2x64xf32>, vector<64x256xf32>, vector<2x256xf32> -> vector<2x256xf32>
    %166 = arith.addf %164, %165 : vector<2x256xf32>
    %167 = vector.extract_strided_slice %166 {offsets = [0, 0], sizes = [2, 192], strides = [1, 1]} : vector<2x256xf32> to vector<2x192xf32>
    %168 = arith.negf %167 : vector<2x192xf32>
    %169 = math.exp %168 : vector<2x192xf32>
    %cst_40 = arith.constant 1.000000e+00 : f32
    %170 = vector.broadcast %cst_40 : f32 to vector<2x192xf32>
    %171 = arith.addf %170, %169 : vector<2x192xf32>
    %172 = arith.divf %170, %171 : vector<2x192xf32>
    %173 = vector.extract_strided_slice %166 {offsets = [0, 192], sizes = [2, 64], strides = [1, 1]} : vector<2x256xf32> to vector<2x64xf32>
    %174 = math.tanh %173 : vector<2x64xf32>
    %175 = vector.extract_strided_slice %172 {offsets = [0, 64], sizes = [2, 64], strides = [1, 1]} : vector<2x192xf32> to vector<2x64xf32>
    %176 = arith.mulf %175, %156 : vector<2x64xf32>
    %177 = vector.extract_strided_slice %172 {offsets = [0, 0], sizes = [2, 64], strides = [1, 1]} : vector<2x192xf32> to vector<2x64xf32>
    %178 = arith.mulf %177, %174 : vector<2x64xf32>
    %179 = arith.addf %176, %178 : vector<2x64xf32>
    %180 = vector.extract_strided_slice %172 {offsets = [0, 128], sizes = [2, 64], strides = [1, 1]} : vector<2x192xf32> to vector<2x64xf32>
    %181 = math.tanh %179 : vector<2x64xf32>
    %182 = arith.mulf %180, %181 : vector<2x64xf32>
    %183 = vector.broadcast %23 : vector<1x64xf32> to vector<2x64xf32>
    %184 = arith.mulf %182, %183 : vector<2x64xf32>
    %cst_41 = arith.constant dense<0.000000e+00> : vector<2xf32>
    %185 = vector.multi_reduction <add>, %184, %cst_41 [1] : vector<2x64xf32> to vector<2xf32>
    %186 = vector.shape_cast %185 : vector<2xf32> to vector<2x1xf32>
    %187 = vector.extract_strided_slice %21 {offsets = [14, 0], sizes = [2, 256], strides = [1, 1]} : vector<16x256xf32> to vector<2x256xf32>
    %cst_42 = arith.constant dense<0.000000e+00> : vector<2x256xf32>
    %188 = tpu.matmul %182, %22, %cst_42 {dimension_numbers = #tpu.dot_dimension_numbers<[1], [0], [0], [1], [0, 0, 1, 1], [], []>} : vector<2x64xf32>, vector<64x256xf32>, vector<2x256xf32> -> vector<2x256xf32>
    %189 = arith.addf %187, %188 : vector<2x256xf32>
    %190 = vector.extract_strided_slice %189 {offsets = [0, 0], sizes = [2, 192], strides = [1, 1]} : vector<2x256xf32> to vector<2x192xf32>
    %191 = arith.negf %190 : vector<2x192xf32>
    %192 = math.exp %191 : vector<2x192xf32>
    %cst_43 = arith.constant 1.000000e+00 : f32
    %193 = vector.broadcast %cst_43 : f32 to vector<2x192xf32>
    %194 = arith.addf %193, %192 : vector<2x192xf32>
    %195 = arith.divf %193, %194 : vector<2x192xf32>
    %196 = vector.extract_strided_slice %189 {offsets = [0, 192], sizes = [2, 64], strides = [1, 1]} : vector<2x256xf32> to vector<2x64xf32>
    %197 = math.tanh %196 : vector<2x64xf32>
    %198 = vector.extract_strided_slice %195 {offsets = [0, 64], sizes = [2, 64], strides = [1, 1]} : vector<2x192xf32> to vector<2x64xf32>
    %199 = arith.mulf %198, %179 : vector<2x64xf32>
    %200 = vector.extract_strided_slice %195 {offsets = [0, 0], sizes = [2, 64], strides = [1, 1]} : vector<2x192xf32> to vector<2x64xf32>
    %201 = arith.mulf %200, %197 : vector<2x64xf32>
    %202 = arith.addf %199, %201 : vector<2x64xf32>
    %203 = vector.extract_strided_slice %195 {offsets = [0, 128], sizes = [2, 64], strides = [1, 1]} : vector<2x192xf32> to vector<2x64xf32>
    %204 = math.tanh %202 : vector<2x64xf32>
    %205 = arith.mulf %203, %204 : vector<2x64xf32>
    %206 = vector.broadcast %23 : vector<1x64xf32> to vector<2x64xf32>
    %207 = arith.mulf %205, %206 : vector<2x64xf32>
    %cst_44 = arith.constant dense<0.000000e+00> : vector<2xf32>
    %208 = vector.multi_reduction <add>, %207, %cst_44 [1] : vector<2x64xf32> to vector<2xf32>
    %209 = vector.shape_cast %208 : vector<2xf32> to vector<2x1xf32>
    %c0_45 = arith.constant 0 : index
    %c0_46 = arith.constant 0 : index
    %210 = vector.load %arg10[%c0_45, %c0_46] : memref<2x64xf32, #tpu.memory_space<vmem>>, vector<2x64xf32>
    tpu.vector_store %arg10[%c0_45, %c0_46], %205 {strides = array<i32>} : memref<2x64xf32, #tpu.memory_space<vmem>>, vector<2x64xf32>,
    %c0_47 = arith.constant 0 : index
    %c0_48 = arith.constant 0 : index
    %211 = vector.load %arg11[%c0_47, %c0_48] : memref<2x64xf32, #tpu.memory_space<vmem>>, vector<2x64xf32>
    tpu.vector_store %arg11[%c0_47, %c0_48], %202 {strides = array<i32>} : memref<2x64xf32, #tpu.memory_space<vmem>>, vector<2x64xf32>,
    %212 = tpu.concatenate %48, %71, %94, %117, %140, %163, %186, %209 in 0 : vector<2x1xf32>, vector<2x1xf32>, vector<2x1xf32>, vector<2x1xf32>, vector<2x1xf32>, vector<2x1xf32>, vector<2x1xf32>, vector<2x1xf32> -> vector<16x1xf32>
    %213 = arith.addf %16, %212 : vector<16x1xf32>
    %c0_49 = arith.constant 0 : index
    %c0_50 = arith.constant 0 : index
    %214 = vector.load %arg8[%c0_49, %c0_50] : memref<1x1xf32, #tpu.memory_space<vmem>>, vector<1x1xf32>
    %215 = vector.broadcast %214 : vector<1x1xf32> to vector<16x1xf32>
    %216 = arith.addf %213, %215 : vector<16x1xf32>
    %c0_51 = arith.constant 0 : index
    %c0_52 = arith.constant 0 : index
    %217 = vector.load %arg9[%c0_51, %c0_52] : memref<16x1xf32, #tpu.memory_space<vmem>>, vector<16x1xf32>
    tpu.vector_store %arg9[%c0_51, %c0_52], %216 {strides = array<i32>} : memref<16x1xf32, #tpu.memory_space<vmem>>, vector<16x1xf32>,
    return
  }
}

</mosaic_0001>

<bundles_post_ra>
// kernel: critic_forward.1
= control target key start
LH: loop header
LB: loop body
LE: loop exit
PB: predicated region body
PF: predicated region fallthrough
CT: control target
= control target key end

     0   :  { %s2117_s0 = inlined_call_operand.vmem [shape: f32[16,22], index: 0, kind: input, shape index: {}]   ;;  %s2118_s1 = inlined_call_operand.vmem [shape: f32[22,128], index: 1, kind: input, shape index: {}]   ;;  %s2119_s2 = inlined_call_operand.vmem [shape: f32[1,128], index: 2, kind: input, shape index: {}]   ;;  %s2120_s3 = inlined_call_operand.hbm [shape: f32[128,256], index: 3, kind: input, shape index: {}]   ;;  %s2121_s4 = inlined_call_operand.hbm [shape: f32[64,256], index: 4, kind: input, shape index: {}]   ;;  %s2122_s5 = inlined_call_operand.vmem [shape: f32[1,256], index: 5, kind: input, shape index: {}]   ;;  %s2123_s6 = inlined_call_operand.vmem [shape: f32[1,64], index: 6, kind: input, shape index: {}]   ;;  %s2124_s7 = inlined_call_operand.vmem [shape: f32[1,64], index: 7, kind: input, shape index: {}]   ;;  %s2125_s8 = inlined_call_operand.<no memory space> [shape: f32[1,1], index: 8, kind: input, shape index: {}]   ;;  %s2126_s9 = inlined_call_operand.vmem [shape: f32[16,1], index: 9, kind: output, shape index: {0}]   ;;  %s2127_s10 = inlined_call_operand.hbm [shape: f32[2,64], index: 10, kind: output, shape index: {1}]   ;;  %s2128_s11 = inlined_call_operand.hbm [shape: f32[2,64], index: 11, kind: output, shape index: {2}]  }
   0x1   :  { %v17_v0 = vstv %s2125_s8 }
   0x2   :  { %18 = vst [vmem:[#allocation2] sm:$0x1] %v17_v0 }
   0x3   :  { %19 = vsyncpa [#allocation4], 0 }
   0x4   :  { %20 = vsyncpa [#allocation7], 0 }
   0x5   :  { %21 = vsyncpa [#allocation5], 0 }
   0x6   :  { %22 = vsyncpa [#allocation10], 0  ;;  %s1747_s19 = smov [#allocation3]   ;;  %s1651_s23 = scalar_lea.hbm %s2120_s3, 4096 }
   0x7   :  { %s34_s20 = sshll.u32 %s1747_s19, 4  ;;  %p1652_p0 = scmp.ne.s32.totalorder %s2120_s3, %s1651_s23  ;;  %s35_s20 = int_to_ptr.vmem [resolvable:$true] %s34_s20 }
   0x8   :  { %p1655_p1 = scmp.lt.u32.totalorder %s1651_s23, %s2120_s3 }
   0xa   :  { %p1657_p2 = pnand %p1655_p1, %p1652_p0 }
   0xc   :  { %1660 = shalt.err (!%p1657_p2)
}
   0xd   :  { %s1661_s8 = scalar_lea.vmem %s35_s20, 4096  ;;  %p1666_p4 = scmp.lt.s32.totalorder %s35_s20, %s35_s20 }
   0xe   :  { %p1662_p3 = scmp.ne.s32.totalorder %s35_s20, %s1661_s8  ;;  %p1667_p5 = scmp.lt.s32.totalorder %s1661_s8, %s1661_s8 }
  0x10   :  { %p1668_p6 = por %p1667_p5, %p1666_p4 }
  0x12   :  { %p1669_p7 = pnand %p1668_p6, %p1662_p3 }
  0x14   :  { %1672 = shalt.err (!%p1669_p7)
}
  0x15   :  { %s1748_s28 = smov 256   ;;  %s1749_s29 = smov 16  }
  0x16   :  { %40 = dma.hbm_to_vmem [thread:$0]  %s2120_s3, 4096, %s35_s20, [#allocation4], %s1748_s28, %s1748_s28, %s1749_s29  }
  0x17   :  { %s1750_s13 = smov [#allocation6]   ;;  %s1673_s17 = scalar_lea.hbm %s2121_s4, 2048 }
  0x18   :  { %s46_s14 = sshll.u32 %s1750_s13, 4  ;;  %p1674_p8 = scmp.ne.s32.totalorder %s2121_s4, %s1673_s17  ;;  %s47_s14 = int_to_ptr.vmem [resolvable:$true] %s46_s14 }
  0x19   :  { %p1677_p9 = scmp.lt.u32.totalorder %s1673_s17, %s2121_s4 }
  0x1b   :  { %p1679_p10 = pnand %p1677_p9, %p1674_p8 }
  0x1d   :  { %1682 = shalt.err (!%p1679_p10)
}
  0x1e   :  { %s1683_s23 = scalar_lea.vmem %s47_s14, 2048  ;;  %p1688_p12 = scmp.lt.s32.totalorder %s47_s14, %s47_s14 }
  0x1f   :  { %p1684_p11 = scmp.ne.s32.totalorder %s47_s14, %s1683_s23  ;;  %p1689_p13 = scmp.lt.s32.totalorder %s1683_s23, %s1683_s23 }
  0x21   :  { %p1690_p0 = por %p1689_p13, %p1688_p12 }
  0x23   :  { %p1691_p1 = pnand %p1690_p0, %p1684_p11 }
  0x25   :  { %1694 = shalt.err (!%p1691_p1)
}
  0x26   :  { %52 = dma.hbm_to_vmem [thread:$0]  %s2121_s4, 2048, %s47_s14, [#allocation7], %s1748_s28, %s1748_s28, %s1749_s29  }
  0x27   :  { %1739 = dma.done.wait [#allocation4], 4096  }
  0x28   :  { %1740 = vsyncadd [#allocation4], 4294963200 }
  0x29   :  { %1741 = dma.done.wait [#allocation7], 2048  }
  0x2a   :  { %1742 = vsyncadd [#allocation7], 4294965248  ;;  %vm79_vm0 = vcmask 179200   ;;  %v69_v1 = vld [vmem:[%s2118_s1] sm:$0xff]  ;;  %v70_v2 = vld [vmem:[%s2118_s1 + $0x8] sm:$0xff]  ;;  %vm86_vm1 = vcmask 1045504  }
  0x2b   :  { %v1383_v3 = vpack.c.bf16 %v70_v2, %v69_v1  ;;  %v71_v4 = vld [vmem:[%s2118_s1 + $0x10] sm:$0x3f]  ;;  %v67_v5 = vld [vmem:[%s2117_s0] sm:$0xff]  ;;  %v68_v19 = vld [vmem:[%s2117_s0 + $0x8] sm:$0xff]  ;;  %s1752_s15 = smov 64   ;;  %vm180_vm4 = vcmask 523264  }
  0x2c   :  { %v188_v6 = vld [vmem:[#allocation3 + $0x8] sm:$0xff]  ;;  %1380 = vmatprep.mubr.msk.f32.mxu0 %vm79_vm0, %v67_v5  ;;  %v190_v7 = vld [vmem:[#allocation3 + $0x18] sm:$0xff]  ;;  %v187_v8 = vld [vmem:[#allocation3] sm:$0xff]  ;;  %vm438_vm5 = vcmask 517120   ;;  %vm558_vm6 = vcmask 519170   ;;  %vm679_vm7 = vcmask 521220  }
  0x2d   :  { %v189_v9 = vld [vmem:[#allocation3 + $0x10] sm:$0xff]  ;;  %1384 = vmatprep.subr.bf16.mxu0 %v1383_v3  ;;  %v1387_v10 = vpack.c.bf16 %v190_v7, %v188_v6  ;;  %v192_v12 = vld [vmem:[#allocation3 + $0x28] sm:$0xff]  ;;  %v194_v13 = vld [vmem:[#allocation3 + $0x38] sm:$0xff]  ;;  %vm800_vm8 = vcmask 523270   ;;  %vm1283_vm9 = vcmask 1041408   ;;  %vm1285_vm10 = vcmask 1043456  }
  0x2e   :  { %v1389_v11 = vpack.c.bf16 %v189_v9, %v187_v8  ;;  %v191_v14 = vld [vmem:[#allocation3 + $0x20] sm:$0xff]  ;;  %1386 = vmatpush3.bf16.msra.mxu0 %v1383_v3  ;;  %v1391_v15 = vpack.c.bf16 %v194_v13, %v192_v12  ;;  %v193_v16 = vld [vmem:[#allocation3 + $0x30] sm:$0xff]  ;;  %v196_v17 = vld [vmem:[#allocation3 + $0x48] sm:$0xff]  ;;  %vm1302_vm11 = vcmask 7168   ;;  %s1753_s18 = smov [#allocation8]  }
  0x2f   :  { %v198_v18 = vld [vmem:[#allocation3 + $0x58] sm:$0xff]  ;;  %1378 = vmatprep.subr.msk.mxu0 %vm86_vm1, %v71_v4  ;;  %1388 = vmatprep.subr.bf16.mxu1 %v1387_v10  ;;  %v1393_v20 = vpack.c.bf16 %v193_v16, %v191_v14  ;;  %v195_v22 = vld [vmem:[#allocation3 + $0x40] sm:$0xff]  ;;  %v197_v23 = vld [vmem:[#allocation3 + $0x50] sm:$0xff]  ;;  %s1313_s19 = sshll.u32 %s1753_s18, 4  ;;  %s1314_s19 = int_to_ptr.vmem [resolvable:$true] %s1313_s19 }
  0x30   :  { %1390 = vmatpush1.bf16.msra.mxu1 %v1389_v11  ;;  %v1395_v21 = vpack.c.bf16 %v198_v18, %v196_v17  ;;  %v200_v24 = vld [vmem:[#allocation3 + $0x68] sm:$0xff]  ;;  %v202_v25 = vld [vmem:[#allocation3 + $0x78] sm:$0xff]  ;;  %v308_v29 = vld [vmem:[#allocation6] sm:$0xff]  ;;  %v1397_v31 = vpack.c.bf16 %v197_v23, %v195_v22  ;;  %s1695_s21 = scalar_lea.vmem %s1314_s19, 32  ;;  %p1700_p3 = scmp.lt.s32.totalorder %s1314_s19, %s1314_s19 }
  0x31   :  { %1392 = vmatprep.subr.bf16.mxu1 %v1391_v15  ;;  %v309_v26 = vld [vmem:[#allocation6 + $0x8] sm:$0xff]  ;;  %v311_v27 = vld [vmem:[#allocation6 + $0x18] sm:$0xff]  ;;  %v310_v30 = vld [vmem:[#allocation6 + $0x10] sm:$0xff]  ;;  %v1399_v35 = vpack.c.bf16 %v202_v25, %v200_v24  ;;  %v1751_v15 = vmov 0.0   ;;  %p1696_p2 = scmp.ne.s32.totalorder %s1314_s19, %s1695_s21  ;;  %p1701_p4 = scmp.lt.s32.totalorder %s1695_s21, %s1695_s21 }
  0x32   :  { %1379 = vmatpush3.msk.msra.mxu0 %vm86_vm1, %v71_v4  ;;  %v1861_v28 = vpack.c.bf16 %v311_v27, %v309_v26  ;;  %v199_v32 = vld [vmem:[#allocation3 + $0x60] sm:$0xff]  ;;  %v201_v33 = vld [vmem:[#allocation3 + $0x70] sm:$0xff]  ;;  %v1863_v34 = vpack.c.bf16 %v310_v30, %v308_v29  ;;  %v313_v36 = vld [vmem:[#allocation6 + $0x28] sm:$0xff]  ;;  %295 = vmatprep.mubr.f32.mxu1 %v1751_v15  ;;  %v221_v30 = vlaneseq }
  0x33   :  { %1381 = vmatmul.mubr.msk.f32.vlgmr.msra.gmra.mrb[0].mxu0 %vm79_vm0, %v68_v19  ;;  %v315_v37 = vld [vmem:[#allocation6 + $0x38] sm:$0xff]  ;;  %v312_v38 = vld [vmem:[#allocation6 + $0x20] sm:$0xff]  ;;  %v204_v39 = vld [vmem:[#allocation3 + $0x88] sm:$0xff]  ;;  %v1401_v44 = vpack.c.bf16 %v201_v33, %v199_v32  ;;  %p1702_p5 = por %p1701_p4, %p1700_p3 }
  0x34   :  { %1394 = vmatpush1.bf16.msra.mxu1 %v1393_v20  ;;  %1420 = vmatprep.subr.bf16.mxu0 %v1861_v28  ;;  %v206_v40 = vld [vmem:[#allocation3 + $0x98] sm:$0xff]  ;;  %v1867_v41 = vpack.c.bf16 %v315_v37, %v313_v36  ;;  %v314_v42 = vld [vmem:[#allocation6 + $0x30] sm:$0xff]  ;;  %v203_v46 = vld [vmem:[#allocation3 + $0x80] sm:$0xff] }
  0x35   :  { %1396 = vmatprep.subr.bf16.mxu1 %v1395_v21  ;;  %1422 = vmatpush1.bf16.msra.mxu0 %v1863_v34  ;;  %v1869_v43 = vpack.c.bf16 %v314_v42, %v312_v38  ;;  %v1403_v45 = vpack.c.bf16 %v206_v40, %v204_v39  ;;  %v205_v47 = vld [vmem:[#allocation3 + $0x90] sm:$0xff]  ;;  %v208_v48 = vld [vmem:[#allocation3 + $0xa8] sm:$0xff]  ;;  %v210_v49 = vld [vmem:[#allocation3 + $0xb8] sm:$0xff]  ;;  %p1703_p6 = pnand %p1702_p5, %p1696_p2 }
  0x36   :  { %1424 = vmatprep.subr.bf16.mxu0 %v1867_v41  ;;  %v1405_v50 = vpack.c.bf16 %v205_v47, %v203_v46  ;;  %v1407_v51 = vpack.c.bf16 %v210_v49, %v208_v48  ;;  %v207_v52 = vld [vmem:[#allocation3 + $0xa0] sm:$0xff]  ;;  %v209_v53 = vld [vmem:[#allocation3 + $0xb0] sm:$0xff]  ;;  %v212_v54 = vld [vmem:[#allocation3 + $0xc8] sm:$0xff]  ;;  %392 = vmatprep.mubr.f32.mxu0 %v1751_v15 }
  0x37   :  { %v214_v55 = vld [vmem:[#allocation3 + $0xd8] sm:$0xff]  ;;  %v1409_v56 = vpack.c.bf16 %v209_v53, %v207_v52  ;;  %v211_v58 = vld [vmem:[#allocation3 + $0xc0] sm:$0xff]  ;;  %v213_v59 = vld [vmem:[#allocation3 + $0xd0] sm:$0xff] }
  0x38   :  { %1398 = vmatpush1.bf16.msra.mxu1 %v1397_v31  ;;  %v1411_v57 = vpack.c.bf16 %v214_v55, %v212_v54  ;;  %v317_v60 = vld [vmem:[#allocation6 + $0x48] sm:$0xff]  ;;  %v1413_v61 = vpack.c.bf16 %v213_v59, %v211_v58  ;;  %v319_v62 = vld [vmem:[#allocation6 + $0x58] sm:$0xff]  ;;  %v316_v63 = vld [vmem:[#allocation6 + $0x40] sm:$0xff]  ;;  %v222_v31 = vshrl.u32 %v221_v30, 7 }
  0x39   :  { %1400 = vmatprep.subr.bf16.mxu1 %v1399_v35  ;;  %1426 = vmatpush1.bf16.msra.mxu0 %v1869_v43  ;;  %v318_v0 = vld [vmem:[#allocation6 + $0x50] sm:$0xff]  ;;  %v1873_v1 = vpack.c.bf16 %v319_v62, %v317_v60  ;;  %v216_v3 = vld [vmem:[#allocation3 + $0xe8] sm:$0xff]  ;;  %v218_v4 = vld [vmem:[#allocation3 + $0xf8] sm:$0xff] }
  0x3a   :  { %v1875_v2 = vpack.c.bf16 %v318_v0, %v316_v63  ;;  %v1415_v5 = vpack.c.bf16 %v218_v4, %v216_v3  ;;  %v215_v6 = vld [vmem:[#allocation3 + $0xe0] sm:$0xff]  ;;  %v217_v7 = vld [vmem:[#allocation3 + $0xf0] sm:$0xff]  ;;  %v321_v8 = vld [vmem:[#allocation6 + $0x68] sm:$0xff]  ;;  %v227_v32 = vsub.s32 1, %v222_v31  ;;  %v223_v36 = vsub.s32 0, %v222_v31 }
  0x3b   :  { %1428 = vmatprep.subr.bf16.mxu0 %v1873_v1  ;;  %v1417_v9 = vpack.c.bf16 %v217_v7, %v215_v6  ;;  %v323_v10 = vld [vmem:[#allocation6 + $0x78] sm:$0xff]  ;;  %v320_v11 = vld [vmem:[#allocation6 + $0x60] sm:$0xff]  ;;  %v322_v12 = vld [vmem:[#allocation6 + $0x70] sm:$0xff] }
  0x3c   :  { %1402 = vmatpush1.bf16.msra.mxu1 %v1401_v44  ;;  %v1879_v13 = vpack.c.bf16 %v323_v10, %v321_v8  ;;  %v1881_v14 = vpack.c.bf16 %v322_v12, %v320_v11  ;;  %v1339_v16 = vld [vmem:[%s2119_s2] ss:$0 sm:$0xff] }
  0x3d   :  { %1404 = vmatprep.subr.bf16.mxu1 %v1403_v45  ;;  %1430 = vmatpush1.bf16.msra.mxu0 %v1875_v2  ;;  %v1905_v22 = vld [vmem:[%s2123_s6] ss:$0 sm:$0xff] }
  0x3e   :  { %1432 = vmatprep.subr.bf16.mxu0 %v1879_v13  ;;  %v219_v33 = vld [vmem:[%s2122_s5] sm:$0x3] }
  0x3f   :  { %v228_v35 = vrot.slane %v219_v33, %v227_v32  ;;  %v224_v40 = vrot.slane %v219_v33, %v223_v36 }
  0x40   :  { %1406 = vmatpush1.bf16.msra.mxu1 %v1405_v50 }
  0x41   :  { %1408 = vmatprep.subr.bf16.mxu1 %v1407_v51  ;;  %1434 = vmatpush1.bf16.msra.mxu0 %v1881_v14 }
  0x42   :  { %1436 = vmatprep.subr.bf16.mxu0 %v1861_v28 }
  0x44   :  { %1410 = vmatpush1.bf16.msra.mxu1 %v1409_v56  ;;  %393 = vmatmul.mubr.f32.vlgmr.msra.gmra.mrb[2].mxu0 %v1751_v15 }
  0x45   :  { %1412 = vmatprep.subr.bf16.mxu1 %v1411_v57  ;;  %1438 = vmatpush1.bf16.msra.mxu0 %v1863_v34 }
  0x46   :  { %509 = vmatprep.mubr.f32.mxu0 %v1751_v15  ;;  %1440 = vmatprep.subr.bf16.mxu0 %v1867_v41 }
  0x48   :  { %1414 = vmatpush1.bf16.msra.mxu1 %v1413_v61 }
  0x49   :  { %1416 = vmatprep.subr.bf16.mxu1 %v1415_v5  ;;  %1442 = vmatpush1.bf16.msra.mxu0 %v1869_v43 }
  0x4a   :  { %1444 = vmatprep.subr.bf16.mxu0 %v1873_v1 }
  0x4c   :  { %1418 = vmatpush1.bf16.msra.mxu1 %v1417_v9 }
  0x4d   :  { %1452 = vmatprep.subr.bf16.mxu1 %v1861_v28  ;;  %1446 = vmatpush1.bf16.msra.mxu0 %v1875_v2 }
  0x4e   :  { %1448 = vmatprep.subr.bf16.mxu0 %v1879_v13 }
  0x51   :  { %1450 = vmatpush1.bf16.msra.mxu0 %v1881_v14 }
  0x52   :  { %1468 = vmatprep.subr.bf16.mxu0 %v1861_v28 }
 0x106   :  { %v1382_v17 = vpop.f32.mrb[0].mxu0 }
 0x107   :  { %v162_v18 = vadd.f32 %v1382_v17, %v1339_v16  ;;  %v156_v19 = vpop.f32.mrb[1].mxu0 }
 0x108   :  { %v157_v20 = vadd.f32 %v1339_v16, %v156_v19 }
 0x109   :  { %v168_v21 = vmul.f32 0.01, %v162_v18  ;;  %vm166_vm2 = vcmp.ge.f32.partialorder %v162_v18, 0.0 }
 0x10a   :  { %v167_v23 = vmul.f32 0.01, %v157_v20  ;;  %vm165_vm3 = vcmp.ge.f32.partialorder %v157_v20, 0.0 }
 0x10b   :  { %v170_v24 = vsel %vm166_vm2, %v162_v18, %v168_v21 }
 0x10c   :  { %v1907_v25 = vsel %vm165_vm3, %v157_v20, %v167_v23  ;;  %v1910_v26 = vmul.f32 %v1905_v22, %v170_v24 }
 0x10d   :  { %296 = vmatmul.mubr.f32.vlgmr.msra.gmra.mrb[0].mxu1 %v1907_v25 }
 0x10e   :  { %301 = vmatprep.mubr.f32.mxu1 %v1751_v15  ;;  %1454 = vmatpush1.bf16.msra.mxu1 %v1863_v34 }
 0x10f   :  { %1456 = vmatprep.subr.bf16.mxu1 %v1867_v41 }
 0x111   :  { %302 = vmatmul.mubr.f32.gmra.mrb[2].mxu1 %v170_v24 }
 0x112   :  { %1458 = vmatpush1.bf16.msra.mxu1 %v1869_v43  ;;  %630 = vmatprep.mubr.f32.mxu1 %v1751_v15 }
 0x113   :  { %1460 = vmatprep.subr.bf16.mxu1 %v1873_v1 }
 0x116   :  { %1462 = vmatpush1.bf16.msra.mxu1 %v1875_v2 }
 0x117   :  { %1464 = vmatprep.subr.bf16.mxu1 %v1879_v13  ;;  %v394_v27 = vpop.f32.mrb[2].mxu0 }
 0x118   :  { %v396_v29 = vpop.f32.mrb[3].mxu0 }
 0x11a   :  { %1466 = vmatpush1.bf16.msra.mxu1 %v1881_v14 }
 0x11b   :  { %1484 = vmatprep.subr.bf16.mxu1 %v1861_v28 }
 0x1e0   :  { %v297_v37 = vpop.f32.mrb[0].mxu1 }
 0x1e1   :  { %v299_v38 = vpop.f32.mrb[1].mxu1  ;;  %v1934_v49 = vadd.f32 %v297_v37, %v224_v40 }
 0x1e2   :  { %v1926_v39 = vadd.f32 %v299_v38, %v228_v35 }
 0x1e3   :  { %v399_v50 = vadd.f32 %v394_v27, %v1934_v49 }
 0x1e4   :  { %v400_v42 = vadd.f32 %v396_v29, %v1926_v39  ;;  %v303_v44 = vpop.f32.mrb[2].mxu1 }
 0x1e5   :  { %v1929_v45 = vadd.f32 %v303_v44, %v224_v40  ;;  %v305_v46 = vpop.f32.mrb[3].mxu1  ;;  %v1344_v51 = vmul.f32 -1.442695, %v399_v50 }
 0x1e6   :  { %1555 = vtanh.f32 %v400_v42  ;;  %v1931_v47 = vadd.f32 %v305_v46, %v228_v35  ;;  %v1345_v61 = vmul.f32 -1.442695, %v400_v42 }
 0x1e7   :  { %1557 = vpow2.f32 %v1344_v51 }
 0x1f0   :  { %v1556_v48 = vpop.eup %1555 }
 0x1f1   :  { %416 = vrot.lane.b32.xlu0 %v1556_v48, %s1752_s15  ;;  %v1558_v52 = vpop.eup %1557 }
 0x1f2   :  { %v407_v53 = vadd.f32 1.0, %v1558_v52 }
 0x1f4   :  { %1559 = vrcp.f32 %v407_v53 }
 0x1fe   :  { %v1560_v54 = vpop.eup %1559 }
 0x1ff   :  { %v414_v57 = vmul.f32 0.0, %v1560_v54 }
 0x263   :  { %v417_v55 = vpop.permute.xlu0 %416 }
 0x264   :  { %v419_v56 = vmul.f32 %v1560_v54, %v417_v55 }
 0x266   :  { %421 = vrot.lane.b32.xlu0 %v419_v56, %s1752_s15 }
 0x2d8   :  { %v422_v58 = vpop.permute.xlu0 %421 }
 0x2d9   :  { %v424_v59 = vadd.f32 %v422_v58, %v414_v57 }
 0x2db   :  { %1561 = vtanh.f32 %v424_v59  ;;  %v538_v21 = vrot.slane %v424_v59, 6 }
 0x2dc   :  { %1563 = vpow2.f32 %v1345_v61 }
 0x2e5   :  { %v1562_v60 = vpop.eup %1561 }
 0x2e6   :  { %427 = vrot.lane.b32.xlu1 %v1562_v60, %s1752_s15  ;;  %v1564_v62 = vpop.eup %1563 }
 0x2e7   :  { %v408_v63 = vadd.f32 1.0, %v1564_v62 }
 0x2e9   :  { %1565 = vrcp.f32 %v408_v63 }
 0x2f3   :  { %v1566_v0 = vpop.eup %1565 }
 0x358   :  { %v428_v3 = vpop.permute.xlu1 %427 }
 0x359   :  { %v1939_v4 = vmul.f32 %v1566_v0, %v428_v3 }
 0x35b   :  { %1347 = vmatmul.mubr.msk.f32.vlgmr.msra.gmra.mrb[4].mxu0 %vm180_vm4, %v1939_v4 }
 0x35c   :  { %1470 = vmatpush1.bf16.msra.mxu0 %v1863_v34  ;;  %751 = vmatprep.mubr.f32.mxu0 %v1751_v15 }
 0x35d   :  { %1472 = vmatprep.subr.bf16.mxu0 %v1867_v41 }
 0x360   :  { %1474 = vmatpush1.bf16.msra.mxu0 %v1869_v43 }
 0x361   :  { %1476 = vmatprep.subr.bf16.mxu0 %v1873_v1 }
 0x364   :  { %1478 = vmatpush1.bf16.msra.mxu0 %v1875_v2 }
 0x365   :  { %1480 = vmatprep.subr.bf16.mxu0 %v1879_v13 }
 0x368   :  { %1482 = vmatpush1.bf16.msra.mxu0 %v1881_v14 }
 0x369   :  { %1500 = vmatprep.subr.bf16.mxu0 %v1861_v28 }
 0x42e   :  { %v511_v5 = vpop.f32.mrb[4].mxu0 }
 0x42f   :  { %v513_v6 = vpop.f32.mrb[5].mxu0  ;;  %v518_v10 = vrot.slane %v511_v5, 6 }
 0x430   :  { %v519_v7 = vrot.slane %v513_v6, 6 }
 0x431   :  { %v522_v11 = vadd.f32 %v518_v10, %v1934_v49 }
 0x432   :  { %v523_v8 = vadd.f32 %v519_v7, %v1926_v39 }
 0x433   :  { %v1348_v12 = vmul.f32 -1.442695, %v522_v11 }
 0x434   :  { %1567 = vtanh.f32 %v523_v8  ;;  %v1349_v30 = vmul.f32 -1.442695, %v523_v8 }
 0x435   :  { %1569 = vpow2.f32 %v1348_v12 }
 0x43e   :  { %v1568_v9 = vpop.eup %1567 }
 0x43f   :  { %542 = vrot.lane.b32.xlu1 %v1568_v9, %s1752_s15  ;;  %v1570_v16 = vpop.eup %1569 }
 0x440   :  { %v530_v17 = vadd.f32 1.0, %v1570_v16 }
 0x442   :  { %1571 = vrcp.f32 %v530_v17 }
 0x44c   :  { %v1572_v18 = vpop.eup %1571 }
 0x44d   :  { %v540_v23 = vmul.f32 %v1572_v18, %v538_v21 }
 0x4b1   :  { %v543_v19 = vpop.permute.xlu1 %542 }
 0x4b2   :  { %v545_v20 = vmul.f32 %v1572_v18, %v543_v19 }
 0x4b4   :  { %547 = vrot.lane.b32.xlu0 %v545_v20, %s1752_s15 }
 0x526   :  { %v548_v24 = vpop.permute.xlu0 %547 }
 0x527   :  { %v550_v27 = vadd.f32 %v548_v24, %v540_v23 }
 0x529   :  { %1573 = vtanh.f32 %v550_v27  ;;  %v659_v57 = vrot.slane %v550_v27, 6 }
 0x52a   :  { %1575 = vpow2.f32 %v1349_v30 }
 0x533   :  { %v1574_v29 = vpop.eup %1573 }
 0x534   :  { %553 = vrot.lane.b32.xlu1 %v1574_v29, %s1752_s15  ;;  %v1576_v31 = vpop.eup %1575 }
 0x535   :  { %v531_v32 = vadd.f32 1.0, %v1576_v31 }
 0x537   :  { %1577 = vrcp.f32 %v531_v32 }
 0x541   :  { %v1578_v33 = vpop.eup %1577 }
 0x5a6   :  { %v554_v35 = vpop.permute.xlu1 %553 }
 0x5a7   :  { %v1957_v36 = vmul.f32 %v1578_v33, %v554_v35 }
 0x5a9   :  { %v563_v37 = vrot.slane %v1957_v36, 2 }
 0x5ab   :  { %1350 = vmatmul.mubr.msk.f32.vlgmr.msra.gmra.mrb[4].mxu1 %vm180_vm4, %v563_v37 }
 0x5ac   :  { %1486 = vmatpush1.bf16.msra.mxu1 %v1863_v34  ;;  %872 = vmatprep.mubr.f32.mxu1 %v1751_v15 }
 0x5ad   :  { %1488 = vmatprep.subr.bf16.mxu1 %v1867_v41 }
 0x5b0   :  { %1490 = vmatpush1.bf16.msra.mxu1 %v1869_v43 }
 0x5b1   :  { %1492 = vmatprep.subr.bf16.mxu1 %v1873_v1 }
 0x5b4   :  { %1494 = vmatpush1.bf16.msra.mxu1 %v1875_v2 }
 0x5b5   :  { %1496 = vmatprep.subr.bf16.mxu1 %v1879_v13 }
 0x5b8   :  { %1498 = vmatpush1.bf16.msra.mxu1 %v1881_v14 }
 0x5b9   :  { %1516 = vmatprep.subr.bf16.mxu1 %v1861_v28 }
 0x67e   :  { %v632_v38 = vpop.f32.mrb[4].mxu1 }
 0x67f   :  { %v634_v40 = vpop.f32.mrb[5].mxu1  ;;  %v639_v48 = vrot.slane %v632_v38, 4 }
 0x680   :  { %v640_v42 = vrot.slane %v634_v40, 4 }
 0x681   :  { %v643_v50 = vadd.f32 %v639_v48, %v1934_v49 }
 0x682   :  { %v644_v44 = vadd.f32 %v640_v42, %v1926_v39 }
 0x683   :  { %v1351_v51 = vmul.f32 -1.442695, %v643_v50 }
 0x684   :  { %1579 = vtanh.f32 %v644_v44  ;;  %v1352_v62 = vmul.f32 -1.442695, %v644_v44 }
 0x685   :  { %1581 = vpow2.f32 %v1351_v51 }
 0x68e   :  { %v1580_v46 = vpop.eup %1579 }
 0x68f   :  { %663 = vrot.lane.b32.xlu0 %v1580_v46, %s1752_s15  ;;  %v1582_v52 = vpop.eup %1581 }
 0x690   :  { %v651_v53 = vadd.f32 1.0, %v1582_v52 }
 0x692   :  { %1583 = vrcp.f32 %v651_v53 }
 0x69c   :  { %v1584_v54 = vpop.eup %1583 }
 0x69d   :  { %v661_v58 = vmul.f32 %v1584_v54, %v659_v57 }
 0x701   :  { %v664_v55 = vpop.permute.xlu0 %663 }
 0x702   :  { %v666_v56 = vmul.f32 %v1584_v54, %v664_v55 }
 0x704   :  { %668 = vrot.lane.b32.xlu1 %v666_v56, %s1752_s15 }
 0x776   :  { %v669_v59 = vpop.permute.xlu1 %668 }
 0x777   :  { %v671_v60 = vadd.f32 %v669_v59, %v661_v58 }
 0x779   :  { %1585 = vtanh.f32 %v671_v60  ;;  %v780_v24 = vrot.slane %v671_v60, 6 }
 0x77a   :  { %1587 = vpow2.f32 %v1352_v62 }
 0x783   :  { %v1586_v61 = vpop.eup %1585 }
 0x784   :  { %674 = vrot.lane.b32.xlu0 %v1586_v61, %s1752_s15  ;;  %v1588_v63 = vpop.eup %1587 }
 0x785   :  { %v652_v0 = vadd.f32 1.0, %v1588_v63 }
 0x787   :  { %1589 = vrcp.f32 %v652_v0 }
 0x791   :  { %v1590_v3 = vpop.eup %1589 }
 0x7f6   :  { %v675_v5 = vpop.permute.xlu0 %674 }
 0x7f7   :  { %v1975_v6 = vmul.f32 %v1590_v3, %v675_v5 }
 0x7f9   :  { %v684_v7 = vrot.slane %v1975_v6, 4 }
 0x7fb   :  { %1353 = vmatmul.mubr.msk.f32.vlgmr.msra.gmra.mrb[6].mxu0 %vm180_vm4, %v684_v7 }
 0x7fc   :  { %1502 = vmatpush1.bf16.msra.mxu0 %v1863_v34  ;;  %985 = vmatprep.mubr.f32.mxu0 %v1751_v15 }
 0x7fd   :  { %1504 = vmatprep.subr.bf16.mxu0 %v1867_v41 }
 0x800   :  { %1506 = vmatpush1.bf16.msra.mxu0 %v1869_v43 }
 0x801   :  { %1508 = vmatprep.subr.bf16.mxu0 %v1873_v1 }
 0x804   :  { %1510 = vmatpush1.bf16.msra.mxu0 %v1875_v2 }
 0x805   :  { %1512 = vmatprep.subr.bf16.mxu0 %v1879_v13 }
 0x808   :  { %1514 = vmatpush1.bf16.msra.mxu0 %v1881_v14 }
 0x809   :  { %1532 = vmatprep.subr.bf16.mxu0 %v1861_v28 }
 0x8ce   :  { %v753_v8 = vpop.f32.mrb[6].mxu0 }
 0x8cf   :  { %v755_v9 = vpop.f32.mrb[7].mxu0  ;;  %v760_v16 = vrot.slane %v753_v8, 2 }
 0x8d0   :  { %v761_v10 = vrot.slane %v755_v9, 2 }
 0x8d1   :  { %v764_v17 = vadd.f32 %v760_v16, %v1934_v49 }
 0x8d2   :  { %v765_v11 = vadd.f32 %v761_v10, %v1926_v39 }
 0x8d3   :  { %v1354_v18 = vmul.f32 -1.442695, %v764_v17 }
 0x8d4   :  { %1591 = vtanh.f32 %v765_v11  ;;  %v1355_v31 = vmul.f32 -1.442695, %v765_v11 }
 0x8d5   :  { %1593 = vpow2.f32 %v1354_v18 }
 0x8de   :  { %v1592_v12 = vpop.eup %1591 }
 0x8df   :  { %784 = vrot.lane.b32.xlu1 %v1592_v12, %s1752_s15  ;;  %v1594_v19 = vpop.eup %1593 }
 0x8e0   :  { %v772_v20 = vadd.f32 1.0, %v1594_v19 }
 0x8e2   :  { %1595 = vrcp.f32 %v772_v20 }
 0x8ec   :  { %v1596_v21 = vpop.eup %1595 }
 0x8ed   :  { %v782_v27 = vmul.f32 %v1596_v21, %v780_v24 }
 0x951   :  { %v785_v23 = vpop.permute.xlu1 %784 }
 0x952   :  { %v787_v28 = vmul.f32 %v1596_v21, %v785_v23 }
 0x954   :  { %789 = vrot.lane.b32.xlu0 %v787_v28, %s1752_s15 }
 0x9c6   :  { %v790_v39 = vpop.permute.xlu0 %789 }
 0x9c7   :  { %v792_v29 = vadd.f32 %v790_v39, %v782_v27 }
 0x9c9   :  { %1597 = vtanh.f32 %v792_v29  ;;  %v895_v56 = vrot.slane %v792_v29, 6 }
 0x9ca   :  { %1599 = vpow2.f32 %v1355_v31 }
 0x9d3   :  { %v1598_v30 = vpop.eup %1597 }
 0x9d4   :  { %795 = vrot.lane.b32.xlu1 %v1598_v30, %s1752_s15  ;;  %v1600_v49 = vpop.eup %1599 }
 0x9d5   :  { %v773_v32 = vadd.f32 1.0, %v1600_v49 }
 0x9d7   :  { %1601 = vrcp.f32 %v773_v32 }
 0x9e1   :  { %v1602_v33 = vpop.eup %1601 }
 0xa46   :  { %v796_v35 = vpop.permute.xlu1 %795 }
 0xa47   :  { %v1993_v37 = vmul.f32 %v1602_v33, %v796_v35 }
 0xa49   :  { %v805_v38 = vrot.slane %v1993_v37, 6 }
 0xa4b   :  { %1356 = vmatmul.mubr.msk.f32.vlgmr.msra.gmra.mrb[6].mxu1 %vm180_vm4, %v805_v38 }
 0xa4c   :  { %1518 = vmatpush1.bf16.msra.mxu1 %v1863_v34  ;;  %1105 = vmatprep.mubr.f32.mxu1 %v1751_v15 }
 0xa4d   :  { %1520 = vmatprep.subr.bf16.mxu1 %v1867_v41 }
 0xa50   :  { %1522 = vmatpush1.bf16.msra.mxu1 %v1869_v43 }
 0xa51   :  { %1524 = vmatprep.subr.bf16.mxu1 %v1873_v1 }
 0xa54   :  { %1526 = vmatpush1.bf16.msra.mxu1 %v1875_v2 }
 0xa55   :  { %1528 = vmatprep.subr.bf16.mxu1 %v1879_v13 }
 0xa58   :  { %1530 = vmatpush1.bf16.msra.mxu1 %v1881_v14 }
 0xb1e   :  { %v874_v40 = vpop.f32.mrb[6].mxu1 }
 0xb1f   :  { %v876_v42 = vpop.f32.mrb[7].mxu1  ;;  %v879_v48 = vadd.f32 %v874_v40, %v1929_v45 }
 0xb20   :  { %v880_v44 = vadd.f32 %v876_v42, %v1931_v47 }
 0xb21   :  { %v1357_v50 = vmul.f32 -1.442695, %v879_v48 }
 0xb22   :  { %1603 = vtanh.f32 %v880_v44  ;;  %v1358_v61 = vmul.f32 -1.442695, %v880_v44 }
 0xb23   :  { %1605 = vpow2.f32 %v1357_v50 }
 0xb2c   :  { %v1604_v46 = vpop.eup %1603 }
 0xb2d   :  { %899 = vrot.lane.b32.xlu0 %v1604_v46, %s1752_s15  ;;  %v1606_v51 = vpop.eup %1605 }
 0xb2e   :  { %v887_v52 = vadd.f32 1.0, %v1606_v51 }
 0xb30   :  { %1607 = vrcp.f32 %v887_v52 }
 0xb3a   :  { %v1608_v53 = vpop.eup %1607 }
 0xb3b   :  { %v897_v57 = vmul.f32 %v1608_v53, %v895_v56  ;;  %v2044_v56 = vld [vmem:[%s2124_s7] ss:$0 sm:$0xff] }
 0xb9f   :  { %v900_v54 = vpop.permute.xlu0 %899 }
 0xba0   :  { %v902_v55 = vmul.f32 %v1608_v53, %v900_v54 }
 0xba2   :  { %904 = vrot.lane.b32.xlu1 %v902_v55, %s1752_s15  ;;  %v178_v55 = vmul.f32 %v1905_v22, %v1907_v25  ;;  %v678_v25 = vmul.f32 %v2044_v56, %v1975_v6 }
 0xc14   :  { %v905_v58 = vpop.permute.xlu1 %904 }
 0xc15   :  { %v907_v59 = vadd.f32 %v905_v58, %v897_v57  ;;  %v181_v57 = vsel %vm180_vm4, %v178_v55, 0.0  ;;  %v437_v58 = vmul.f32 %v2044_v56, %v1939_v4 }
 0xc17   :  { %1609 = vtanh.f32 %v907_v59  ;;  %v1014_v12 = vrot.slane %v907_v59, 6  ;;  %v439_v59 = vsel %vm438_vm5, %v437_v58, 0.0 }
 0xc18   :  { %1611 = vpow2.f32 %v1358_v61  ;;  %v680_v61 = vsel %vm679_vm7, %v678_v25, 0.0 }
 0xc21   :  { %v1610_v60 = vpop.eup %1609 }
 0xc22   :  { %910 = vrot.lane.b32.xlu0 %v1610_v60, %s1752_s15  ;;  %v1612_v62 = vpop.eup %1611  ;;  %v557_v60 = vmul.f32 %v2044_v56, %v1957_v36 }
 0xc23   :  { %v888_v63 = vadd.f32 1.0, %v1612_v62 }
 0xc24   :  { %v559_v22 = vsel %vm558_vm6, %v557_v60, 0.0 }
 0xc25   :  { %1613 = vrcp.f32 %v888_v63 }
 0xc2f   :  { %v1614_v0 = vpop.eup %1613 }
 0xc94   :  { %v911_v3 = vpop.permute.xlu0 %910 }
 0xc95   :  { %v2010_v5 = vmul.f32 %v1614_v0, %v911_v3 }
 0xc97   :  { %1359 = vmatmul.mubr.msk.f32.vlgmr.msra.gmra.mrb[8].mxu0 %vm180_vm4, %v2010_v5  ;;  %v914_v4 = vmul.f32 %v2044_v56, %v2010_v5 }
 0xc98   :  { %1534 = vmatpush1.bf16.msra.mxu0 %v1863_v34  ;;  %1225 = vmatprep.mubr.f32.mxu0 %v1751_v15 }
 0xc99   :  { %1536 = vmatprep.subr.bf16.mxu0 %v1867_v41  ;;  %v915_v62 = vsel %vm438_vm5, %v914_v4, 0.0 }
 0xc9c   :  { %1538 = vmatpush1.bf16.msra.mxu0 %v1869_v43 }
 0xc9d   :  { %1540 = vmatprep.subr.bf16.mxu0 %v1873_v1 }
 0xca0   :  { %1542 = vmatpush1.bf16.msra.mxu0 %v1875_v2 }
 0xca1   :  { %1544 = vmatprep.subr.bf16.mxu0 %v1879_v13 }
 0xca4   :  { %1546 = vmatpush1.bf16.msra.mxu0 %v1881_v14 }
 0xd6a   :  { %v987_v7 = vpop.f32.mrb[8].mxu0 }
 0xd6b   :  { %v989_v8 = vpop.f32.mrb[9].mxu0  ;;  %v994_v41 = vrot.slane %v987_v7, 6 }
 0xd6c   :  { %v995_v9 = vrot.slane %v989_v8, 6 }
 0xd6d   :  { %v998_v43 = vadd.f32 %v994_v41, %v1929_v45 }
 0xd6e   :  { %v999_v10 = vadd.f32 %v995_v9, %v1931_v47 }
 0xd6f   :  { %v1360_v15 = vmul.f32 -1.442695, %v998_v43 }
 0xd70   :  { %1615 = vtanh.f32 %v999_v10  ;;  %v1361_v20 = vmul.f32 -1.442695, %v999_v10 }
 0xd71   :  { %1617 = vpow2.f32 %v1360_v15 }
 0xd7a   :  { %v1616_v34 = vpop.eup %1615 }
 0xd7b   :  { %1018 = vrot.lane.b32.xlu1 %v1616_v34, %s1752_s15  ;;  %v1618_v1 = vpop.eup %1617 }
 0xd7c   :  { %v1006_v2 = vadd.f32 1.0, %v1618_v1 }
 0xd7e   :  { %1619 = vrcp.f32 %v1006_v2 }
 0xd88   :  { %v1620_v13 = vpop.eup %1619 }
 0xd89   :  { %v1016_v16 = vmul.f32 %v1620_v13, %v1014_v12 }
 0xded   :  { %v1019_v11 = vpop.permute.xlu1 %1018 }
 0xdee   :  { %v1021_v14 = vmul.f32 %v1620_v13, %v1019_v11 }
 0xdf0   :  { %1023 = vrot.lane.b32.xlu0 %v1021_v14, %s1752_s15 }
 0xe62   :  { %v1024_v17 = vpop.permute.xlu0 %1023 }
 0xe63   :  { %v1026_v18 = vadd.f32 %v1024_v17, %v1016_v16 }
 0xe65   :  { %1621 = vtanh.f32 %v1026_v18  ;;  %v1134_v50 = vrot.slane %v1026_v18, 6  ;;  %v799_v18 = vmul.f32 %v2044_v56, %v1993_v37 }
 0xe66   :  { %1623 = vpow2.f32 %v1361_v20 }
 0xe6f   :  { %v1622_v19 = vpop.eup %1621 }
 0xe70   :  { %1029 = vrot.lane.b32.xlu1 %v1622_v19, %s1752_s15  ;;  %v1624_v21 = vpop.eup %1623 }
 0xe71   :  { %v1007_v23 = vadd.f32 1.0, %v1624_v21 }
 0xe73   :  { %1625 = vrcp.f32 %v1007_v23 }
 0xe7d   :  { %v1626_v28 = vpop.eup %1625 }
 0xee2   :  { %v1030_v24 = vpop.permute.xlu1 %1029 }
 0xee3   :  { %v2027_v27 = vmul.f32 %v1626_v28, %v1030_v24 }
 0xee5   :  { %v1038_v39 = vrot.slane %v2027_v27, 2  ;;  %v1033_v19 = vmul.f32 %v2044_v56, %v2027_v27 }
 0xee7   :  { %1362 = vmatmul.mubr.msk.f32.vlgmr.msra.gmra.mrb[8].mxu1 %vm180_vm4, %v1038_v39  ;;  %v1034_v20 = vsel %vm558_vm6, %v1033_v19, 0.0 }
 0xfba   :  { %v1107_v29 = vpop.f32.mrb[8].mxu1 }
 0xfbb   :  { %v1109_v30 = vpop.f32.mrb[9].mxu1  ;;  %v1114_v33 = vrot.slane %v1107_v29, 4 }
 0xfbc   :  { %v1115_v31 = vrot.slane %v1109_v30, 4 }
 0xfbd   :  { %v1118_v35 = vadd.f32 %v1114_v33, %v1929_v45  ;;  %v1368_v33 = vld [vmem:[#allocation2] ss:$0 sm:$0xff] }
 0xfbe   :  { %v1119_v49 = vadd.f32 %v1115_v31, %v1931_v47 }
 0xfbf   :  { %v1363_v38 = vmul.f32 -1.442695, %v1118_v35 }
 0xfc0   :  { %1627 = vtanh.f32 %v1119_v49  ;;  %v1364_v63 = vmul.f32 -1.442695, %v1119_v49 }
 0xfc1   :  { %1629 = vpow2.f32 %v1363_v38 }
 0xfca   :  { %v1628_v32 = vpop.eup %1627 }
 0xfcb   :  { %1138 = vrot.lane.b32.xlu0 %v1628_v32, %s1752_s15  ;;  %v1630_v40 = vpop.eup %1629 }
 0xfcc   :  { %v1126_v42 = vadd.f32 1.0, %v1630_v40 }
 0xfce   :  { %1631 = vrcp.f32 %v1126_v42 }
 0xfd8   :  { %v1632_v44 = vpop.eup %1631 }
 0xfd9   :  { %v1136_v51 = vmul.f32 %v1632_v44, %v1134_v50 }
0x103d   :  { %v1139_v46 = vpop.permute.xlu0 %1138 }
0x103e   :  { %v1141_v48 = vmul.f32 %v1632_v44, %v1139_v46 }
0x1040   :  { %1143 = vrot.lane.b32.xlu1 %v1141_v48, %s1752_s15 }
0x10b2   :  { %v1144_v52 = vpop.permute.xlu1 %1143 }
0x10b3   :  { %v2035_v53 = vadd.f32 %v1144_v52, %v1136_v51 }
0x10b5   :  { %1633 = vtanh.f32 %v2035_v53  ;;  %v1254_v21 = vrot.slane %v2035_v53, 6 }
0x10b6   :  { %1635 = vpow2.f32 %v1364_v63 }
0x10bf   :  { %v1634_v54 = vpop.eup %1633 }
0x10c0   :  { %1149 = vrot.lane.b32.xlu0 %v1634_v54, %s1752_s15  ;;  %v1636_v36 = vpop.eup %1635 }
0x10c1   :  { %v1127_v0 = vadd.f32 1.0, %v1636_v36 }
0x10c3   :  { %1637 = vrcp.f32 %v1127_v0 }
0x10cd   :  { %v1638_v3 = vpop.eup %1637 }
0x10df   :  { %182 = vadd.xlane.f32.xlu0 %v181_v57 }
0x10e3   :  { %440 = vadd.xlane.f32.xlu0 %v439_v59 }
0x10e7   :  { %560 = vadd.xlane.f32.xlu0 %v559_v22 }
0x10eb   :  { %681 = vadd.xlane.f32.xlu0 %v680_v61 }
0x10ef   :  { %916 = vadd.xlane.f32.xlu0 %v915_v62 }
0x1132   :  { %v1150_v7 = vpop.permute.xlu0 %1149 }
0x1133   :  { %v1152_v8 = vmul.f32 %v1638_v3, %v1150_v7 }
0x1135   :  { %v1158_v9 = vrot.slane %v1152_v8, 4  ;;  %v1153_v6 = vmul.f32 %v2044_v56, %v1152_v8 }
0x1137   :  { %1365 = vmatmul.mubr.msk.f32.vlgmr.msra.gmra.mrb[10].mxu0 %vm180_vm4, %v1158_v9  ;;  %v1154_v10 = vsel %vm679_vm7, %v1153_v6, 0.0 }
0x1138   :  { %1155 = vadd.xlane.f32.xlu0 %v1154_v10 }
0x116c   :  { %v183_v37 = vpop.xlane.xlu0 %182 }
0x1170   :  { %v441_v39 = vpop.xlane.xlu0 %440 }
0x1174   :  { %v561_v29 = vpop.xlane.xlu0 %560 }
0x1175   :  { %v1284_v31 = vsel %vm1283_vm9, %v441_v39, %v561_v29 }
0x1178   :  { %v682_v27 = vpop.xlane.xlu0 %681 }
0x1179   :  { %v1286_v49 = vsel %vm1285_vm10, %v1284_v31, %v682_v27 }
0x120a   :  { %v1227_v5 = vpop.f32.mrb[10].mxu0 }
0x120b   :  { %v1229_v34 = vpop.f32.mrb[11].mxu0  ;;  %v1234_v1 = vrot.slane %v1227_v5, 2 }
0x120c   :  { %v1235_v41 = vrot.slane %v1229_v34, 2 }
0x120d   :  { %v1238_v2 = vadd.f32 %v1234_v1, %v1929_v45  ;;  %v801_v45 = vsel %vm800_vm8, %v799_v18, 0.0 }
0x120e   :  { %v1239_v43 = vadd.f32 %v1235_v41, %v1931_v47  ;;  %v184_v47 = vsel %vm180_vm4, %v1910_v26, 0.0 }
0x120f   :  { %v1366_v13 = vmul.f32 -1.442695, %v1238_v2 }
0x1210   :  { %1639 = vtanh.f32 %v1239_v43  ;;  %v1367_v42 = vmul.f32 -1.442695, %v1239_v43 }
0x1211   :  { %1641 = vpow2.f32 %v1366_v13 }
0x121a   :  { %v1640_v15 = vpop.eup %1639 }
0x121b   :  { %1258 = vrot.lane.b32.xlu1 %v1640_v15, %s1752_s15  ;;  %v1642_v11 = vpop.eup %1641 }
0x121c   :  { %v1246_v14 = vadd.f32 1.0, %v1642_v11 }
0x121e   :  { %1643 = vrcp.f32 %v1246_v14 }
0x1228   :  { %v1644_v12 = vpop.eup %1643 }
0x1229   :  { %v1256_v23 = vmul.f32 %v1644_v12, %v1254_v21 }
0x128d   :  { %v1259_v16 = vpop.permute.xlu1 %1258 }
0x128e   :  { %v1261_v17 = vmul.f32 %v1644_v12, %v1259_v16 }
0x1290   :  { %1263 = vrot.lane.b32.xlu1 %v1261_v17, %s1752_s15 }
0x12b4   :  { %185 = vadd.xlane.f32.xlu1 %v184_v47 }
0x12b8   :  { %802 = vadd.xlane.f32.xlu1 %v801_v45 }
0x12bc   :  { %1035 = vadd.xlane.f32.xlu1 %v1034_v20 }
0x1302   :  { %v1264_v28 = vpop.permute.xlu1 %1263 }
0x1303   :  { %v1266_v24 = vadd.f32 %v1264_v28, %v1256_v23 }
0x1305   :  { %1645 = vtanh.f32 %v1266_v24 }
0x1306   :  { %1647 = vpow2.f32 %v1367_v42 }
0x130f   :  { %v1646_v26 = vpop.eup %1645 }
0x1310   :  { %1269 = vrot.lane.b32.xlu1 %v1646_v26, %s1752_s15  ;;  %v1648_v44 = vpop.eup %1647 }
0x1311   :  { %v1247_v46 = vadd.f32 1.0, %v1648_v44 }
0x1313   :  { %1649 = vrcp.f32 %v1247_v46 }
0x131d   :  { %v1650_v50 = vpop.eup %1649 }
0x1341   :  { %v186_v30 = vpop.xlane.xlu1 %185 }
0x1345   :  { %v803_v32 = vpop.xlane.xlu1 %802 }
0x1346   :  { %v1287_v35 = vsel %vm86_vm1, %v1286_v49, %v803_v32 }
0x1347   :  { %v1291_v38 = vadd.f32 %v1287_v35, %v183_v37 }
0x1349   :  { %v1300_v40 = vadd.f32 %v1368_v33, %v1291_v38  ;;  %v1036_v48 = vpop.xlane.xlu1 %1035 }
0x134b   :  { %1303 = vst.msk [vmem:[%s2126_s9] sm:$0xff] %vm1302_vm11, %v1300_v40 }
0x1382   :  { %v1270_v51 = vpop.permute.xlu1 %1269 }
0x1383   :  { %v1272_v52 = vmul.f32 %v1650_v50, %v1270_v51 }
0x1385   :  { %1277 = vst.msk [vmem:[#allocation8 - $0x6] sm:$0xc0] %vm800_vm8, %v1272_v52  ;;  %v1273_v53 = vmul.f32 %v2044_v56, %v1272_v52 }
0x1387   :  { %v1274_v54 = vsel %vm800_vm8, %v1273_v53, 0.0 }
0x1388   :  { %1275 = vadd.xlane.f32.xlu0 %v1274_v54 }
0x1389   :  { %1706 = shalt.err (!%p1703_p6)
}
0x138a   :  { %s1707_s3 = scalar_lea.hbm %s2127_s10, 32 }
0x138b   :  { %p1708_p7 = scmp.ne.s32.totalorder %s2127_s10, %s1707_s3  ;;  %p1711_p8 = scmp.lt.u32.totalorder %s1707_s3, %s2127_s10 }
0x138d   :  { %p1713_p9 = pnand %p1711_p8, %p1708_p7 }
0x138f   :  { %1716 = shalt.err (!%p1713_p9)
}
0x1390   :  { %1316 = dma.vmem_to_hbm [thread:$0]  %s1314_s19, 32, %s2127_s10, [#allocation5]   ;;  %v917_v55 = vpop.xlane.xlu0 %916 }
0x1391   :  { %v1288_v57 = vsel %vm1283_vm9, %v917_v55, %v1036_v48  ;;  %s1754_s30 = smov [#allocation9]  }
0x1392   :  { %s1323_s12 = sshll.u32 %s1754_s30, 4  ;;  %s1324_s12 = int_to_ptr.vmem [resolvable:$true] %s1323_s12 }
0x1393   :  { %s1717_s1 = scalar_lea.vmem %s1324_s12, 32  ;;  %p1722_p11 = scmp.lt.s32.totalorder %s1324_s12, %s1324_s12 }
0x1394   :  { %v1156_v56 = vpop.xlane.xlu0 %1155  ;;  %p1718_p10 = scmp.ne.s32.totalorder %s1324_s12, %s1717_s1  ;;  %p1723_p12 = scmp.lt.s32.totalorder %s1717_s1, %s1717_s1 }
0x1395   :  { %v1289_v58 = vsel %vm1285_vm10, %v1288_v57, %v1156_v56 }
0x1396   :  { %p1724_p13 = por %p1723_p12, %p1722_p11 }
0x1398   :  { %p1725_p0 = pnand %p1724_p13, %p1718_p10 }
0x139e   :  { %1279 = vrot.lane.b32.xlu0 %v1266_v24, %s1752_s15 }
0x1415   :  { %v1276_v59 = vpop.xlane.xlu0 %1275 }
0x1416   :  { %v1290_v60 = vsel %vm86_vm1, %v1289_v58, %v1276_v59 }
0x1417   :  { %v1292_v22 = vadd.f32 %v1290_v60, %v186_v30 }
0x1419   :  { %v1301_v25 = vadd.f32 %v1368_v33, %v1292_v22  ;;  %v1280_v61 = vpop.permute.xlu0 %1279 }
0x141a   :  { %1282 = vst.msk [vmem:[#allocation9 - $0x6] sm:$0xc0] %vm800_vm8, %v1280_v61 }
0x141b   :  { %1304 = vst.msk [vmem:[%s2126_s9 + $0x8] sm:$0xff] %vm1302_vm11, %v1301_v25 }
0x141c   :  { %1728 = shalt.err (!%p1725_p0)
}
0x141d   :  { %s1729_s29 = scalar_lea.hbm %s2128_s11, 32 }
0x141e   :  { %p1730_p1 = scmp.ne.s32.totalorder %s2128_s11, %s1729_s29  ;;  %p1733_p2 = scmp.lt.u32.totalorder %s1729_s29, %s2128_s11 }
0x1420   :  { %p1735_p3 = pnand %p1733_p2, %p1730_p1 }
0x1422   :  { %1738 = shalt.err (!%p1735_p3)
}
0x1423   :  { %1326 = dma.vmem_to_hbm [thread:$0]  %s1324_s12, 32, %s2128_s11, [#allocation10]  }
0x1424   :  { %1743 = dma.done.wait [#allocation5], 32  }
0x1425   :  { %1744 = vsyncadd [#allocation5], 4294967264 }
0x1426   :  { %1745 = dma.done.wait [#allocation10], 32  }
0x1427   :  { %1746 = vsyncadd [#allocation10], 4294967264 }
0x1428   :  { %1335 = vsyncpa [#allocation4], 1 }
0x1429   :  { %1336 = vsyncpa [#allocation7], 1 }
0x142a   :  { %1337 = vsyncpa [#allocation5], 1 }
0x142b   :  { %1338 = vsyncpa [#allocation10], 1 }

</bundles_post_ra>
